<compile_context>
chip_gen: v6e
topology: v6e:2x2x1
jax: 0.10.0
libtpu: 0.0.40
codegen_flags: <defaults>
</compile_context>

<pallas_src>
import math
import functools

import jax
import jax.numpy as jnp
from jax import lax
from jax.experimental import pallas as pl
from jax.experimental.pallas import tpu as pltpu


# ----------------------------- Pallas kernel --------------------------------
def _convlstm_kernel(scale, B, HW, Chid, compute_dtype,
                     x_ref, h_ref, c_ref, patch_ref,
                     wconv_ref, bconv_ref, wfus_ref, bfus_ref, pe_ref,
                     hnext_ref, cnext_ref):
    x = x_ref[...]            # (Cin,  B*HW)  query / value  (compute_dtype)
    h = h_ref[...]            # (Chid, B*HW)  key            (compute_dtype)
    c = c_ref[...]            # (Chid, B*HW)  f32

    # ---- cross attention: softmax((q @ k^T) * scale, dim=-1) @ v ------------
    # Per-batch matmuls on lane-aligned slices; B is tiny & static -> unrolled.
    cross_parts = []
    for b in range(B):
        xb = x[:, b * HW:(b + 1) * HW]
        hb = h[:, b * HW:(b + 1) * HW]
        energy = lax.dot_general(xb, hb, (((1,), (1,)), ((), ())),
                                 preferred_element_type=jnp.float32) * scale
        energy = energy - jnp.max(energy, axis=-1, keepdims=True)
        e = jnp.exp(energy)
        attn = e * pl.reciprocal(jnp.sum(e, axis=-1, keepdims=True), approx=True)
        cross_parts.append(jnp.dot(attn.astype(compute_dtype), xb,
                                   preferred_element_type=jnp.float32))
    cross = jnp.concatenate(cross_parts, axis=1)           # (Cin, B*HW) f32

    # ---- fusion: per-pixel Linear(2C -> C) on cat([h_cur, cross]) + ReLU ----
    fus_in = jnp.concatenate([h, cross.astype(compute_dtype)], axis=0)  # (2C, B*HW)
    fusion = jnp.dot(wfus_ref[...], fus_in,
                     preferred_element_type=jnp.float32) + bfus_ref[...]
    fusion = jnp.maximum(fusion, 0.0)

    # ---- positional encoding add + sigmoid ----------------------------------
    # TODO(synk): nn.Dropout(p=0.1) in PositionEncoding is stochastic in train
    # mode; eval-mode identity here.
    pos = jax.nn.sigmoid(fusion + pe_ref[...])             # (Chid, B*HW)

    # ---- fused Conv2d gates: ONE (4C, KKC) @ (KKC, B*HW) matmul --------------
    cc = jnp.dot(wconv_ref[...], patch_ref[...],
                 preferred_element_type=jnp.float32) + bconv_ref[...]   # (4C, B*HW)
    i_g = jax.nn.sigmoid(cc[0 * Chid:1 * Chid])
    f_g = jax.nn.sigmoid(cc[1 * Chid:2 * Chid])
    o_g = jax.nn.sigmoid(cc[2 * Chid:3 * Chid])
    g_g = jnp.tanh(cc[3 * Chid:4 * Chid])

    c_next = f_g * c + pos
    h_next = o_g * jnp.tanh(c_next) + i_g * g_g + pos

    hnext_ref[...] = h_next
    cnext_ref[...] = c_next


# --------------------------- parameter preparation ---------------------------
def prepare_params(params, *, batch, height, width, attention_size,
                   compute_dtype=jnp.float32):
    """Hoist static plumbing out of the per-timestep forward (do once per model)."""
    HW = height * width
    wconv = params["wconv"]                                   # (4C, Ctot, k, k)
    Chid4, Ctot, k, _ = wconv.shape
    Chid = Chid4 // 4
    assert attention_size >= HW, "PositionEncoding max_seq_len must cover H*W"
    return {
        "wconv": wconv.reshape(Chid4, Ctot * k * k).astype(compute_dtype),
        "bconv": params["bconv"].reshape(Chid4, 1).astype(jnp.float32),
        "wfus":  params["wfus"].astype(compute_dtype),        # (C, 2C)
        "bfus":  params["bfus"].reshape(Chid, 1).astype(jnp.float32),
        "pe":    jnp.tile(params["pe"][:, :HW], (1, batch)).astype(jnp.float32),
        "kernel_size": int(k),
        "scale": 1.0 / math.sqrt(attention_size),
        "compute_dtype": compute_dtype,
        "batch": int(batch),
        "hw": int(HW),
    }


# ------------------------------- forward wrapper ------------------------------
def convlstm_cell_forward(x, h, c, prep):
    B, Cin, H, W = x.shape
    Chid = h.shape[1]
    assert Cin == Chid, "Attention (energy @ values) requires Cin == Chid"
    HW = H * W
    assert prep["batch"] == B and prep["hw"] == HW
    k = prep["kernel_size"]
    p = (k - 1) // 2
    Ctot = Cin + Chid
    KKC = Ctot * k * k
    cdt = prep["compute_dtype"]

    # --- glue: fold batch into the lane axis: (B, C, H, W) -> (C, B*HW) ------
    def to_lane_folded(a, C, dtype):
        return a.reshape(B, C, HW).transpose(1, 0, 2).reshape(C, B * HW).astype(dtype)

    x_l = to_lane_folded(x, Cin, cdt)
    h_l = to_lane_folded(h, Chid, cdt)
    c_l = to_lane_folded(c, Chid, jnp.float32)

    # --- im2col of cat([x, h]) (pure data movement) ---------------------------
    # TODO(synk): at production H,W do the im2col inside the kernel (DMA a padded
    # (Ctot, H+2p, W+2p) tile, build k*k shifted views) instead of materializing
    # the k*k-inflated patch tensor in HBM.
    comb = jnp.concatenate([x, h], axis=1)                    # (B, Ctot, H, W)
    comb_pad = jnp.pad(comb, ((0, 0), (0, 0), (p, p), (p, p)))
    slabs = [comb_pad[:, :, dy:dy + H, dx:dx + W]
             for dy in range(k) for dx in range(k)]
    patches = jnp.stack(slabs, axis=2).reshape(B, KKC, HW)
    patches_l = patches.transpose(1, 0, 2).reshape(KKC, B * HW).astype(cdt)

    kernel = functools.partial(_convlstm_kernel, prep["scale"], B, HW, Chid, cdt)
    vmem_spec = functools.partial(pl.BlockSpec, memory_space=pltpu.MemorySpace.VMEM)

    # Single kernel invocation (no grid): whole-batch tiles resident in VMEM.
    # TODO(synk): on v7x (2 TCs) a 2-way 'parallel' split of the B*HW lane axis
    # for the conv/gating part would use both cores; left single-core here.
    h_l_next, c_l_next = pl.pallas_call(
        kernel,
        out_shape=(jax.ShapeDtypeStruct((Chid, B * HW), jnp.float32),
                   jax.ShapeDtypeStruct((Chid, B * HW), jnp.float32)),
        in_specs=[vmem_spec()] * 9,
        out_specs=(vmem_spec(), vmem_spec()),
    )(x_l, h_l, c_l, patches_l,
      prep["wconv"], prep["bconv"], prep["wfus"], prep["bfus"], prep["pe"])

    def from_lane_folded(a):
        return a.reshape(Chid, B, HW).transpose(1, 0, 2).reshape(B, Chid, H, W)

    return from_lane_folded(h_l_next), from_lane_folded(c_l_next)


# --------------------------- parameters / buffers ----------------------------
def make_position_encoding(d_model, seq_len):
    position = jnp.arange(seq_len, dtype=jnp.float32)[:, None]                 # (S, 1)
    div_term = jnp.exp(jnp.arange(0, d_model, 2, dtype=jnp.float32)
                       * -(math.log(10000.0) / d_model))                       # (d/2,)
    pe = jnp.zeros((seq_len, d_model), dtype=jnp.float32)
    pe = pe.at[:, 0::2].set(jnp.sin(position * div_term))
    pe = pe.at[:, 1::2].set(jnp.cos(position * div_term))
    return pe.T                                                                 # (d_model, S)


def init_params(key, Cin, Chid, k, attention_size):
    k1, k2, k3, k4 = jax.random.split(key, 4)
    s = 0.1
    return {
        "wconv": s * jax.random.normal(k1, (4 * Chid, Cin + Chid, k, k), jnp.float32),
        "bconv": s * jax.random.normal(k2, (4 * Chid,), jnp.float32),
        "wfus":  s * jax.random.normal(k3, (Chid, 2 * Chid), jnp.float32),
        "bfus":  s * jax.random.normal(k4, (Chid,), jnp.float32),
        "pe":    make_position_encoding(Chid, attention_size),
    }


# ---------------------------- pure-JAX reference -----------------------------
def reference_forward(x, h, c, params, *, kernel_size, attention_size):
    B, Cin, H, W = x.shape
    Chid = h.shape[1]
    HW = H * W
    scale = 1.0 / math.sqrt(attention_size)
    q = x.reshape(B, Cin, HW)
    ky = h.reshape(B, Chid, HW)
    v = x.reshape(B, Cin, HW)
    energy = jnp.einsum("bcs,bds->bcd", q, ky) * scale
    attn = jax.nn.softmax(energy, axis=2)
    cross = jnp.einsum("bcd,bds->bcs", attn, v).reshape(B, Cin, H, W)
    fus_in = jnp.concatenate([h, cross], axis=1)
    fusion = jnp.einsum("od,bdhw->bohw", params["wfus"], fus_in) \
             + params["bfus"][None, :, None, None]
    fusion = jnp.maximum(fusion, 0.0).reshape(B, Chid, HW)
    pos = jax.nn.sigmoid(fusion + params["pe"][:, :HW][None]).reshape(B, Chid, H, W)
    comb = jnp.concatenate([x, h], axis=1)
    cc = lax.conv_general_dilated(comb, params["wconv"], (1, 1), "SAME",
                                  dimension_numbers=("NCHW", "OIHW", "NCHW"))
    cc = cc + params["bconv"][None, :, None, None]
    i_g = jax.nn.sigmoid(cc[:, 0:Chid])
    f_g = jax.nn.sigmoid(cc[:, Chid:2 * Chid])
    o_g = jax.nn.sigmoid(cc[:, 2 * Chid:3 * Chid])
    g_g = jnp.tanh(cc[:, 3 * Chid:4 * Chid])
    c_next = f_g * c + pos
    h_next = o_g * jnp.tanh(c_next) + i_g * g_g + pos
    return h_next, c_next


# ----------------------------------- main ------------------------------------
if __name__ == "__main__":
    # Cin == Chid required by the Attention bmm; Chid multiple of 8 keeps the
    # fused-gate row slices sublane-aligned.
    B, Cin, Chid, H, W = 2, 8, 8, 16, 16
    K = 3
    ATT = H * W                            # attenion_size ctor arg -> scale & PE length

    key = jax.random.PRNGKey(0)
    kx, kh, kc, kp = jax.random.split(key, 4)
    x  = jax.random.normal(kx, (B, Cin, H, W), jnp.float32)
    h0 = jax.random.normal(kh, (B, Chid, H, W), jnp.float32)
    c0 = jax.random.normal(kc, (B, Chid, H, W), jnp.float32)
    params = init_params(kp, Cin, Chid, K, ATT)

    h_ref, c_ref = reference_forward(x, h0, c0, params,
                                     kernel_size=K, attention_size=ATT)

    # f32 MXU operands (v5e-friendly path) — tight tolerance.
    prep32 = prepare_params(params, batch=B, height=H, width=W,
                            attention_size=ATT, compute_dtype=jnp.float32)
    h32, c32 = convlstm_cell_forward(x, h0, c0, prep32)
    jax.block_until_ready((h32, c32))
    assert jnp.allclose(h32, h_ref, atol=5e-4, rtol=5e-4)
    assert jnp.allclose(c32, c_ref, atol=5e-4, rtol=5e-4)

    # bf16 MXU operands with f32 accumulation (v6e/v7x fast path) — looser tol
    # (bf16 operand quantization + approx softmax reciprocal).
    prep16 = prepare_params(params, batch=B, height=H, width=W,
                            attention_size=ATT, compute_dtype=jnp.bfloat16)
    h16, c16 = convlstm_cell_forward(x, h0, c0, prep16)
    jax.block_until_ready((h16, c16))
    assert jnp.allclose(h16, h_ref, atol=3e-2, rtol=3e-2)
    assert jnp.allclose(c16, c_ref, atol=3e-2, rtol=3e-2)

    print("KERNEL_OK")
</pallas_src>

<mosaic_0001>
module attributes {stable_mosaic.version = 11 : i64} {
  func.func @_convlstm_kernel(%arg0: memref<8x512xf32, #tpu.memory_space<vmem>>, %arg1: memref<8x512xf32, #tpu.memory_space<vmem>>, %arg2: memref<8x512xf32, #tpu.memory_space<vmem>>, %arg3: memref<144x512xf32, #tpu.memory_space<vmem>>, %arg4: memref<32x144xf32, #tpu.memory_space<vmem>>, %arg5: memref<32x1xf32, #tpu.memory_space<vmem>>, %arg6: memref<8x16xf32, #tpu.memory_space<vmem>>, %arg7: memref<8x1xf32, #tpu.memory_space<vmem>>, %arg8: memref<8x512xf32, #tpu.memory_space<vmem>>, %arg9: memref<8x512xf32, #tpu.memory_space<vmem>>, %arg10: memref<8x512xf32, #tpu.memory_space<vmem>>) attributes {dimension_semantics = [], scalar_prefetch = 0 : i64, scratch_operands = 0 : i64, tpu.core_type = #tpu.core_type<tc>} {
    %c0 = arith.constant 0 : index
    %c0_0 = arith.constant 0 : index
    %0 = vector.load %arg0[%c0, %c0_0] : memref<8x512xf32, #tpu.memory_space<vmem>>, vector<8x512xf32>
    %c0_1 = arith.constant 0 : index
    %c0_2 = arith.constant 0 : index
    %1 = vector.load %arg1[%c0_1, %c0_2] : memref<8x512xf32, #tpu.memory_space<vmem>>, vector<8x512xf32>
    %c0_3 = arith.constant 0 : index
    %c0_4 = arith.constant 0 : index
    %2 = vector.load %arg2[%c0_3, %c0_4] : memref<8x512xf32, #tpu.memory_space<vmem>>, vector<8x512xf32>
    %3 = vector.extract_strided_slice %0 {offsets = [0, 0], sizes = [8, 256], strides = [1, 1]} : vector<8x512xf32> to vector<8x256xf32>
    %4 = vector.extract_strided_slice %1 {offsets = [0, 0], sizes = [8, 256], strides = [1, 1]} : vector<8x512xf32> to vector<8x256xf32>
    %cst = arith.constant dense<0.000000e+00> : vector<8x8xf32>
    %5 = tpu.matmul %3, %4, %cst {dimension_numbers = #tpu.dot_dimension_numbers<[1], [1], [0], [0], [0, 0, 1, 0], [], []>} : vector<8x256xf32>, vector<8x256xf32>, vector<8x8xf32> -> vector<8x8xf32>
    %cst_5 = arith.constant 6.250000e-02 : f32
    %6 = vector.broadcast %cst_5 : f32 to vector<8x8xf32>
    %7 = arith.mulf %5, %6 : vector<8x8xf32>
    %cst_6 = arith.constant dense<0xFF800000> : vector<8xf32>
    %8 = vector.multi_reduction <maximumf>, %7, %cst_6 [1] : vector<8x8xf32> to vector<8xf32>
    %9 = vector.shape_cast %8 : vector<8xf32> to vector<8x1xf32>
    %10 = vector.broadcast %9 : vector<8x1xf32> to vector<8x8xf32>
    %11 = arith.subf %7, %10 : vector<8x8xf32>
    %12 = math.exp %11 : vector<8x8xf32>
    %cst_7 = arith.constant dense<0.000000e+00> : vector<8xf32>
    %13 = vector.multi_reduction <add>, %12, %cst_7 [1] : vector<8x8xf32> to vector<8xf32>
    %14 = vector.shape_cast %13 : vector<8xf32> to vector<8x1xf32>
    %15 = tpu.reciprocal %14 {approx = true} : vector<8x1xf32> -> vector<8x1xf32>
    %16 = vector.broadcast %15 : vector<8x1xf32> to vector<8x8xf32>
    %17 = arith.mulf %12, %16 : vector<8x8xf32>
    %cst_8 = arith.constant dense<0.000000e+00> : vector<8x256xf32>
    %18 = tpu.matmul %17, %3, %cst_8 {dimension_numbers = #tpu.dot_dimension_numbers<[1], [0], [0], [1], [0, 0, 1, 1], [], []>} : vector<8x8xf32>, vector<8x256xf32>, vector<8x256xf32> -> vector<8x256xf32>
    %19 = vector.extract_strided_slice %0 {offsets = [0, 256], sizes = [8, 256], strides = [1, 1]} : vector<8x512xf32> to vector<8x256xf32>
    %20 = vector.extract_strided_slice %1 {offsets = [0, 256], sizes = [8, 256], strides = [1, 1]} : vector<8x512xf32> to vector<8x256xf32>
    %cst_9 = arith.constant dense<0.000000e+00> : vector<8x8xf32>
    %21 = tpu.matmul %19, %20, %cst_9 {dimension_numbers = #tpu.dot_dimension_numbers<[1], [1], [0], [0], [0, 0, 1, 0], [], []>} : vector<8x256xf32>, vector<8x256xf32>, vector<8x8xf32> -> vector<8x8xf32>
    %cst_10 = arith.constant 6.250000e-02 : f32
    %22 = vector.broadcast %cst_10 : f32 to vector<8x8xf32>
    %23 = arith.mulf %21, %22 : vector<8x8xf32>
    %cst_11 = arith.constant dense<0xFF800000> : vector<8xf32>
    %24 = vector.multi_reduction <maximumf>, %23, %cst_11 [1] : vector<8x8xf32> to vector<8xf32>
    %25 = vector.shape_cast %24 : vector<8xf32> to vector<8x1xf32>
    %26 = vector.broadcast %25 : vector<8x1xf32> to vector<8x8xf32>
    %27 = arith.subf %23, %26 : vector<8x8xf32>
    %28 = math.exp %27 : vector<8x8xf32>
    %cst_12 = arith.constant dense<0.000000e+00> : vector<8xf32>
    %29 = vector.multi_reduction <add>, %28, %cst_12 [1] : vector<8x8xf32> to vector<8xf32>
    %30 = vector.shape_cast %29 : vector<8xf32> to vector<8x1xf32>
    %31 = tpu.reciprocal %30 {approx = true} : vector<8x1xf32> -> vector<8x1xf32>
    %32 = vector.broadcast %31 : vector<8x1xf32> to vector<8x8xf32>
    %33 = arith.mulf %28, %32 : vector<8x8xf32>
    %cst_13 = arith.constant dense<0.000000e+00> : vector<8x256xf32>
    %34 = tpu.matmul %33, %19, %cst_13 {dimension_numbers = #tpu.dot_dimension_numbers<[1], [0], [0], [1], [0, 0, 1, 1], [], []>} : vector<8x8xf32>, vector<8x256xf32>, vector<8x256xf32> -> vector<8x256xf32>
    %35 = tpu.concatenate %18, %34 in 1 : vector<8x256xf32>, vector<8x256xf32> -> vector<8x512xf32>
    %36 = tpu.concatenate %1, %35 in 0 : vector<8x512xf32>, vector<8x512xf32> -> vector<16x512xf32>
    %c0_14 = arith.constant 0 : index
    %c0_15 = arith.constant 0 : index
    %37 = vector.load %arg6[%c0_14, %c0_15] : memref<8x16xf32, #tpu.memory_space<vmem>>, vector<8x16xf32>
    %cst_16 = arith.constant dense<0.000000e+00> : vector<8x512xf32>
    %38 = tpu.matmul %37, %36, %cst_16 {dimension_numbers = #tpu.dot_dimension_numbers<[1], [0], [0], [1], [0, 0, 1, 1], [], []>} : vector<8x16xf32>, vector<16x512xf32>, vector<8x512xf32> -> vector<8x512xf32>
    %c0_17 = arith.constant 0 : index
    %c0_18 = arith.constant 0 : index
    %39 = vector.load %arg7[%c0_17, %c0_18] : memref<8x1xf32, #tpu.memory_space<vmem>>, vector<8x1xf32>
    %40 = vector.broadcast %39 : vector<8x1xf32> to vector<8x512xf32>
    %41 = arith.addf %38, %40 : vector<8x512xf32>
    %cst_19 = arith.constant 0.000000e+00 : f32
    %42 = vector.broadcast %cst_19 : f32 to vector<8x512xf32>
    %43 = arith.maximumf %41, %42 : vector<8x512xf32>
    %c0_20 = arith.constant 0 : index
    %c0_21 = arith.constant 0 : index
    %44 = vector.load %arg8[%c0_20, %c0_21] : memref<8x512xf32, #tpu.memory_space<vmem>>, vector<8x512xf32>
    %45 = arith.addf %43, %44 : vector<8x512xf32>
    %46 = arith.negf %45 : vector<8x512xf32>
    %47 = math.exp %46 : vector<8x512xf32>
    %cst_22 = arith.constant 1.000000e+00 : f32
    %48 = vector.broadcast %cst_22 : f32 to vector<8x512xf32>
    %49 = arith.addf %48, %47 : vector<8x512xf32>
    %50 = arith.divf %48, %49 : vector<8x512xf32>
    %c0_23 = arith.constant 0 : index
    %c0_24 = arith.constant 0 : index
    %51 = vector.load %arg4[%c0_23, %c0_24] : memref<32x144xf32, #tpu.memory_space<vmem>>, vector<32x144xf32>
    %c0_25 = arith.constant 0 : index
    %c0_26 = arith.constant 0 : index
    %52 = vector.load %arg3[%c0_25, %c0_26] : memref<144x512xf32, #tpu.memory_space<vmem>>, vector<144x512xf32>
    %cst_27 = arith.constant dense<0.000000e+00> : vector<32x512xf32>
    %53 = tpu.matmul %51, %52, %cst_27 {dimension_numbers = #tpu.dot_dimension_numbers<[1], [0], [0], [1], [0, 0, 1, 1], [], []>} : vector<32x144xf32>, vector<144x512xf32>, vector<32x512xf32> -> vector<32x512xf32>
    %c0_28 = arith.constant 0 : index
    %c0_29 = arith.constant 0 : index
    %54 = vector.load %arg5[%c0_28, %c0_29] : memref<32x1xf32, #tpu.memory_space<vmem>>, vector<32x1xf32>
    %55 = vector.broadcast %54 : vector<32x1xf32> to vector<32x512xf32>
    %56 = arith.addf %53, %55 : vector<32x512xf32>
    %57 = vector.extract_strided_slice %56 {offsets = [0, 0], sizes = [8, 512], strides = [1, 1]} : vector<32x512xf32> to vector<8x512xf32>
    %58 = arith.negf %57 : vector<8x512xf32>
    %59 = math.exp %58 : vector<8x512xf32>
    %cst_30 = arith.constant 1.000000e+00 : f32
    %60 = vector.broadcast %cst_30 : f32 to vector<8x512xf32>
    %61 = arith.addf %60, %59 : vector<8x512xf32>
    %62 = arith.divf %60, %61 : vector<8x512xf32>
    %63 = vector.extract_strided_slice %56 {offsets = [8, 0], sizes = [8, 512], strides = [1, 1]} : vector<32x512xf32> to vector<8x512xf32>
    %64 = arith.negf %63 : vector<8x512xf32>
    %65 = math.exp %64 : vector<8x512xf32>
    %cst_31 = arith.constant 1.000000e+00 : f32
    %66 = vector.broadcast %cst_31 : f32 to vector<8x512xf32>
    %67 = arith.addf %66, %65 : vector<8x512xf32>
    %68 = arith.divf %66, %67 : vector<8x512xf32>
    %69 = vector.extract_strided_slice %56 {offsets = [16, 0], sizes = [8, 512], strides = [1, 1]} : vector<32x512xf32> to vector<8x512xf32>
    %70 = arith.negf %69 : vector<8x512xf32>
    %71 = math.exp %70 : vector<8x512xf32>
    %cst_32 = arith.constant 1.000000e+00 : f32
    %72 = vector.broadcast %cst_32 : f32 to vector<8x512xf32>
    %73 = arith.addf %72, %71 : vector<8x512xf32>
    %74 = arith.divf %72, %73 : vector<8x512xf32>
    %75 = vector.extract_strided_slice %56 {offsets = [24, 0], sizes = [8, 512], strides = [1, 1]} : vector<32x512xf32> to vector<8x512xf32>
    %76 = math.tanh %75 : vector<8x512xf32>
    %77 = arith.mulf %68, %2 : vector<8x512xf32>
    %78 = arith.addf %77, %50 : vector<8x512xf32>
    %79 = math.tanh %78 : vector<8x512xf32>
    %80 = arith.mulf %74, %79 : vector<8x512xf32>
    %81 = arith.mulf %62, %76 : vector<8x512xf32>
    %82 = arith.addf %80, %81 : vector<8x512xf32>
    %83 = arith.addf %82, %50 : vector<8x512xf32>
    %c0_33 = arith.constant 0 : index
    %c0_34 = arith.constant 0 : index
    %84 = vector.load %arg9[%c0_33, %c0_34] : memref<8x512xf32, #tpu.memory_space<vmem>>, vector<8x512xf32>
    tpu.vector_store %arg9[%c0_33, %c0_34], %83 {strides = array<i32>} : memref<8x512xf32, #tpu.memory_space<vmem>>, vector<8x512xf32>,
    %c0_35 = arith.constant 0 : index
    %c0_36 = arith.constant 0 : index
    %85 = vector.load %arg10[%c0_35, %c0_36] : memref<8x512xf32, #tpu.memory_space<vmem>>, vector<8x512xf32>
    tpu.vector_store %arg10[%c0_35, %c0_36], %78 {strides = array<i32>} : memref<8x512xf32, #tpu.memory_space<vmem>>, vector<8x512xf32>,
    return
  }
}

</mosaic_0001>

<bundles_post_ra>
// kernel: tpu_custom_call.1
= control target key start
LH: loop header
LB: loop body
LE: loop exit
PB: predicated region body
PF: predicated region fallthrough
CT: control target
= control target key end

     0   :  { %16 = vsyncpa [#allocation3], 0  ;;  %s1547_s0 = inlined_call_operand.vmem [shape: f32[8,512], index: 0, kind: input, shape index: {}]   ;;  %s1548_s1 = inlined_call_operand.hbm [shape: f32[8,512], index: 1, kind: input, shape index: {}]   ;;  %s1549_s2 = inlined_call_operand.hbm [shape: f32[8,512], index: 2, kind: input, shape index: {}]   ;;  %s1550_s3 = inlined_call_operand.hbm [shape: f32[144,512], index: 3, kind: input, shape index: {}]   ;;  %s1551_s4 = inlined_call_operand.hbm [shape: f32[32,144], index: 4, kind: input, shape index: {}]   ;;  %s1552_s5 = inlined_call_operand.vmem [shape: f32[32,1], index: 5, kind: input, shape index: {}]   ;;  %s1553_s6 = inlined_call_operand.vmem [shape: f32[8,16], index: 6, kind: input, shape index: {}]   ;;  %s1554_s7 = inlined_call_operand.vmem [shape: f32[8,1], index: 7, kind: input, shape index: {}]   ;;  %s1555_s8 = inlined_call_operand.hbm [shape: f32[8,512], index: 8, kind: input, shape index: {}]   ;;  %s1556_s9 = inlined_call_operand.hbm [shape: f32[8,512], index: 9, kind: output, shape index: {0}]   ;;  %s1557_s10 = inlined_call_operand.hbm [shape: f32[8,512], index: 10, kind: output, shape index: {1}]  }
   0x1   :  { %17 = vsyncpa [#allocation6], 0 }
   0x2   :  { %18 = vsyncpa [#allocation9], 0 }
   0x3   :  { %19 = vsyncpa [#allocation4], 0 }
   0x4   :  { %20 = vsyncpa [#allocation13], 0  ;;  %s1330_s13 = smov [#allocation5]   ;;  %s1331_s15 = smov [#allocation8]  }
   0x5   :  { %s39_s14 = sshll.u32 %s1330_s13, 4  ;;  %s60_s16 = sshll.u32 %s1331_s15, 4  ;;  %s40_s14 = int_to_ptr.vmem [resolvable:$true] %s39_s14  ;;  %s61_s16 = int_to_ptr.vmem [resolvable:$true] %s60_s16 }
   0x6   :  { %s1188_s17 = scalar_lea.vmem %s40_s14, 512  ;;  %p1193_p1 = scmp.lt.s32.totalorder %s40_s14, %s40_s14 }
   0x7   :  { %p1189_p0 = scmp.ne.s32.totalorder %s40_s14, %s1188_s17  ;;  %p1194_p2 = scmp.lt.s32.totalorder %s1188_s17, %s1188_s17 }
   0x9   :  { %p1195_p3 = por %p1194_p2, %p1193_p1 }
   0xb   :  { %p1196_p4 = pnand %p1195_p3, %p1189_p0 }
   0xd   :  { %1199 = shalt.err (!%p1196_p4)
}
   0xe   :  { %42 = dma.hbm_to_vmem [thread:$0]  %s1549_s2, 512, %s40_s14, [#allocation6]  }
   0xf   :  { %s1208_s20 = scalar_lea.vmem %s61_s16, 1024  ;;  %p1213_p6 = scmp.lt.s32.totalorder %s61_s16, %s61_s16 }
  0x10   :  { %p1209_p5 = scmp.ne.s32.totalorder %s61_s16, %s1208_s20  ;;  %p1214_p7 = scmp.lt.s32.totalorder %s1208_s20, %s1208_s20 }
  0x12   :  { %p1215_p8 = por %p1214_p7, %p1213_p6 }
  0x14   :  { %p1216_p9 = pnand %p1215_p8, %p1209_p5 }
  0x16   :  { %1219 = shalt.err (!%p1216_p9)
}
  0x17   :  { %s1332_s21 = smov 256   ;;  %s1333_s22 = smov 16  }
  0x18   :  { %66 = dma.hbm_to_vmem [thread:$0]  %s1551_s4, 1024, %s61_s16, [#allocation9], %s1332_s21, %s1332_s21, %s1333_s22  }
  0x19   :  { %s1334_s25 = smov [#allocation2]   ;;  %s1335_s27 = smov [#allocation7]  }
  0x1a   :  { %s29_s26 = sshll.u32 %s1334_s25, 4  ;;  %s48_s28 = sshll.u32 %s1335_s27, 4  ;;  %s30_s26 = int_to_ptr.vmem [resolvable:$true] %s29_s26  ;;  %s49_s28 = int_to_ptr.vmem [resolvable:$true] %s48_s28 }
  0x1b   :  { %s1228_s2 = scalar_lea.vmem %s30_s26, 512  ;;  %p1233_p11 = scmp.lt.s32.totalorder %s30_s26, %s30_s26 }
  0x1c   :  { %p1229_p10 = scmp.ne.s32.totalorder %s30_s26, %s1228_s2  ;;  %p1234_p12 = scmp.lt.s32.totalorder %s1228_s2, %s1228_s2 }
  0x1e   :  { %p1235_p13 = por %p1234_p12, %p1233_p11 }
  0x20   :  { %p1236_p0 = pnand %p1235_p13, %p1229_p10 }
  0x22   :  { %1239 = shalt.err (!%p1236_p0)
}
  0x23   :  { %32 = dma.hbm_to_vmem [thread:$0]  %s1548_s1, 512, %s30_s26, [#allocation3]  }
  0x24   :  { %s1248_s11 = scalar_lea.vmem %s49_s28, 9216  ;;  %p1253_p2 = scmp.lt.s32.totalorder %s49_s28, %s49_s28 }
  0x25   :  { %p1249_p1 = scmp.ne.s32.totalorder %s49_s28, %s1248_s11  ;;  %p1254_p3 = scmp.lt.s32.totalorder %s1248_s11, %s1248_s11 }
  0x27   :  { %p1255_p4 = por %p1254_p3, %p1253_p2 }
  0x29   :  { %p1256_p5 = pnand %p1255_p4, %p1249_p1 }
  0x2b   :  { %1259 = shalt.err (!%p1256_p5)
}
  0x2c   :  { %s1336_s4 = smov 512   ;;  %s1337_s12 = smov 32  }
  0x2d   :  { %54 = dma.hbm_to_vmem [thread:$0]  %s1550_s3, 9216, %s49_s28, [#allocation6], %s1336_s4, %s1336_s4, %s1337_s12  }
  0x2e   :  { %s1338_s15 = smov [#allocation10]  }
  0x2f   :  { %s79_s16 = sshll.u32 %s1338_s15, 4  ;;  %s80_s16 = int_to_ptr.vmem [resolvable:$true] %s79_s16 }
  0x30   :  { %s1268_s17 = scalar_lea.vmem %s80_s16, 512  ;;  %p1273_p7 = scmp.lt.s32.totalorder %s80_s16, %s80_s16 }
  0x31   :  { %p1269_p6 = scmp.ne.s32.totalorder %s80_s16, %s1268_s17  ;;  %p1274_p8 = scmp.lt.s32.totalorder %s1268_s17, %s1268_s17 }
  0x33   :  { %p1275_p9 = por %p1274_p8, %p1273_p7 }
  0x35   :  { %p1276_p10 = pnand %p1275_p9, %p1269_p6 }
  0x37   :  { %1279 = shalt.err (!%p1276_p10)
}
  0x38   :  { %82 = dma.hbm_to_vmem [thread:$0]  %s1555_s8, 512, %s80_s16, [#allocation9]  }
  0x39   :  { %1320 = dma.done.wait [#allocation3], 512  }
  0x3a   :  { %1321 = vsyncadd [#allocation3], 4294966784 }
  0x3b   :  { %1322 = dma.done.wait [#allocation6], 9728  }
  0x3c   :  { %1323 = vsyncadd [#allocation6], 4294957568 }
  0x3d   :  { %1324 = dma.done.wait [#allocation9], 1536  }
  0x3e   :  { %1325 = vsyncadd [#allocation9], 4294965760  ;;  %v103_v0 = vld [vmem:[#allocation2 + $0x8] sm:$0xff]  ;;  %v102_v1 = vld [vmem:[#allocation2] sm:$0xff]  ;;  %vm181_vm0 = vcmask 64512   ;;  %v1339_v14 = vmov 0.0  }
  0x3f   :  { %v99_v2 = vld [vmem:[%s1547_s0 + $0x8] sm:$0xff]  ;;  %140 = vmatprep.subr.mxu0 %v103_v0  ;;  %v98_v3 = vld [vmem:[%s1547_s0] sm:$0xff]  ;;  %v1421_v13 = vld [vmem:[#allocation2 + $0x18] sm:$0xff]  ;;  %260 = vmatprep.mubr.f32.mxu1 %v1339_v14  ;;  %vm430_vm1 = vcmask 130048  }
  0x40   :  { %174 = vmatprep.mubr.f32.mxu0 %v99_v2  ;;  %141 = vmatpush1.xpose.msra.mxu0 %v102_v1  ;;  %v101_v15 = vld [vmem:[%s1547_s0 + $0x18] sm:$0xff]  ;;  %v100_v16 = vld [vmem:[%s1547_s0 + $0x10] sm:$0xff]  ;;  %v681_v32 = vld [vmem:[#allocation7 + $0x1e8] sm:$0xff] }
  0x41   :  { %226 = vmatprep.subr.mxu1 %v99_v2  ;;  %382 = vmatprep.subr.mxu0 %v101_v15  ;;  %v1432_v20 = vld [vmem:[#allocation2 + $0x10] sm:$0xff]  ;;  %v1445_v33 = vld [vmem:[%s1553_s6] sm:$0xff]  ;;  %v677_v35 = vld [vmem:[#allocation7 + $0x1c8] sm:$0xff] }
  0x42   :  { %227 = vmatpush1.msra.mxu1 %v98_v3  ;;  %v680_v34 = vld [vmem:[#allocation7 + $0x1e0] sm:$0xff]  ;;  %v673_v37 = vld [vmem:[#allocation7 + $0x1a8] sm:$0xff] }
  0x43   :  { %175 = vmatmul.mubr.f32.vlgmr.msra.gmra.mxu0 %v98_v3  ;;  %297 = vmatprep.subr.mxu1 %v1421_v13  ;;  %v676_v36 = vld [vmem:[#allocation7 + $0x1c0] sm:$0xff]  ;;  %v669_v39 = vld [vmem:[#allocation7 + $0x188] sm:$0xff] }
  0x44   :  { %416 = vmatprep.mubr.f32.mxu0 %v1339_v14  ;;  %383 = vmatpush1.msra.mxu0 %v100_v16  ;;  %v672_v38 = vld [vmem:[#allocation7 + $0x1a0] sm:$0xff]  ;;  %v665_v41 = vld [vmem:[#allocation7 + $0x168] sm:$0xff] }
  0x45   :  { %v668_v40 = vld [vmem:[#allocation7 + $0x180] sm:$0xff]  ;;  %v661_v43 = vld [vmem:[#allocation7 + $0x148] sm:$0xff] }
  0x46   :  { %v664_v42 = vld [vmem:[#allocation7 + $0x160] sm:$0xff]  ;;  %v657_v45 = vld [vmem:[#allocation7 + $0x128] sm:$0xff] }
  0x47   :  { %v660_v44 = vld [vmem:[#allocation7 + $0x140] sm:$0xff]  ;;  %v653_v47 = vld [vmem:[#allocation7 + $0x108] sm:$0xff] }
  0x48   :  { %v656_v46 = vld [vmem:[#allocation7 + $0x120] sm:$0xff]  ;;  %v1449_v48 = vld [vmem:[#allocation8 + $0x8] sm:$0xff] }
  0x49   :  { %v652_v49 = vld [vmem:[#allocation7 + $0x100] sm:$0xff]  ;;  %v649_v50 = vld [vmem:[#allocation7 + $0xe8] sm:$0xff] }
  0x4a   :  { %v648_v51 = vld [vmem:[#allocation7 + $0xe0] sm:$0xff]  ;;  %v645_v52 = vld [vmem:[#allocation7 + $0xc8] sm:$0xff] }
  0x4b   :  { %v644_v53 = vld [vmem:[#allocation7 + $0xc0] sm:$0xff]  ;;  %v641_v54 = vld [vmem:[#allocation7 + $0xa8] sm:$0xff] }
  0x4c   :  { %v640_v55 = vld [vmem:[#allocation7 + $0xa0] sm:$0xff]  ;;  %v637_v56 = vld [vmem:[#allocation7 + $0x88] sm:$0xff] }
  0x4d   :  { %v636_v57 = vld [vmem:[#allocation7 + $0x80] sm:$0xff]  ;;  %v633_v58 = vld [vmem:[#allocation7 + $0x68] sm:$0xff] }
  0x4e   :  { %v632_v59 = vld [vmem:[#allocation7 + $0x60] sm:$0xff]  ;;  %v629_v60 = vld [vmem:[#allocation7 + $0x48] sm:$0xff] }
  0x4f   :  { %v628_v61 = vld [vmem:[#allocation7 + $0x40] sm:$0xff]  ;;  %v625_v62 = vld [vmem:[#allocation7 + $0x28] sm:$0xff] }
  0x50   :  { %v624_v63 = vld [vmem:[#allocation7 + $0x20] sm:$0xff]  ;;  %v689_v2 = vld [vmem:[#allocation7 + $0x228] sm:$0xff] }
  0x51   :  { %v688_v3 = vld [vmem:[#allocation7 + $0x220] sm:$0xff] }
 0x103   :  { %v176_v4 = vpop.f32.mrf.mxu0 }
 0x104   :  { %v180_v5 = vmul.f32 0.0625, %v176_v4  ;;  %v685_v4 = vld [vmem:[#allocation7 + $0x208] sm:$0xff] }
 0x105   :  { %v178_v6 = vpop.f32.mrf.mxu0 }
 0x106   :  { %v182_v7 = vsel %vm181_vm0, %v180_v5, -inf  ;;  %v1453_v6 = vld [vmem:[#allocation8] sm:$0xff] }
 0x107   :  { %183 = vmax.xlane.f32.xlu0 %v182_v7  ;;  %v1455_v7 = vld [vmem:[#allocation8 + $0x18] sm:$0xff] }
 0x190   :  { %v184_v8 = vpop.xlane.xlu0 %183 }
 0x191   :  { %v185_v9 = vsub.f32 %v180_v5, %v184_v8  ;;  %v684_v5 = vld [vmem:[#allocation7 + $0x200] sm:$0xff]  ;;  %v1460_v8 = vld [vmem:[#allocation8 + $0x10] sm:$0xff] }
 0x193   :  { %v186_v10 = vmul.f32 1.442695, %v185_v9 }
 0x195   :  { %1092 = vpow2.f32 %v186_v10 }
 0x1a2   :  { %v1093_v11 = vpop.eup %1092 }
 0x1a3   :  { %v188_v12 = vsel %vm181_vm0, %v1093_v11, 0.0 }
 0x1a4   :  { %189 = vadd.xlane.f32.xlu0 %v188_v12  ;;  %v1466_v12 = vld [vmem:[#allocation8 + $0x28] sm:$0xff] }
 0x22d   :  { %v190_v17 = vpop.xlane.xlu0 %189 }
 0x22e   :  { %1094 = vrcp.f32 %v190_v17  ;;  %v1477_v17 = vld [vmem:[#allocation8 + $0x30] sm:$0xff] }
 0x23b   :  { %v1095_v18 = vpop.eup %1094 }
 0x23c   :  { %v192_v19 = vmul.f32 %v1095_v18, %v1093_v11  ;;  %v693_v18 = vld [vmem:[%s1552_s5 + $0x8] sm:$0xff] }
 0x23e   :  { %1049 = vmatmul.mubr.msk.f32.vlgmr.msra.gmra.mxu1 %vm181_vm0, %v192_v19  ;;  %v1340_v19 = vmov 0  }
 0x23f   :  { %298 = vmatpush1.xpose.msra.mxu1 %v1432_v20  ;;  %331 = vmatprep.mubr.f32.mxu1 %v101_v15  ;;  %v1470_v15 = vld [vmem:[#allocation8 + $0x20] sm:$0xff] }
 0x240   :  { %1090 = vset.pattern.permute.xlu0 %v1340_v19  ;;  %1091 = vset.pattern.permute.xlu1 %v1340_v19 }
 0x242   :  { %332 = vmatmul.mubr.f32.vlgmr.msra.gmra.mxu1 %v100_v16  ;;  %v1473_v16 = vld [vmem:[#allocation8 + $0x38] sm:$0xff] }
 0x243   :  { %498 = vmatprep.mubr.f32.mxu1 %v1339_v14 }
 0x2fe   :  { %v262_v21 = vpop.f32.mrf.mxu1 }
 0x300   :  { %v264_v22 = vpop.f32.mrf.mxu1 }
 0x301   :  { %462 = vmatprep.subr.mxu1 %v264_v22  ;;  %v694_v22 = vld [vmem:[%s1552_s5 + $0x10] sm:$0xff] }
 0x302   :  { %v333_v23 = vpop.f32.mrf.mxu1  ;;  %463 = vmatpush1.msra.mxu1 %v262_v21  ;;  %v692_v21 = vld [vmem:[%s1552_s5] sm:$0xff] }
 0x303   :  { %v337_v24 = vmul.f32 0.0625, %v333_v23  ;;  %464 = vmatprep.subr.mxu1 %v103_v0  ;;  %v621_v0 = vld [vmem:[#allocation7 + $0x8] sm:$0xff]  ;;  %v695_v23 = vld [vmem:[%s1552_s5 + $0x18] sm:$0xff]  ;;  %s1341_s5 = smov [#allocation12]  }
 0x304   :  { %v335_v25 = vpop.f32.mrf.mxu1  ;;  %465 = vmatpush1.msra.mxu1 %v102_v1  ;;  %v620_v1 = vld [vmem:[#allocation7] sm:$0xff]  ;;  %s1034_s12 = sshll.u32 %s1341_s5, 4  ;;  %s1035_s12 = int_to_ptr.vmem [resolvable:$true] %s1034_s12 }
 0x305   :  { %v338_v26 = vsel %vm181_vm0, %v337_v24, -inf  ;;  %728 = vmatprep.subr.mxu1 %v681_v32  ;;  %1051 = vmatmul.mubr.msk.f32.vlgmr.msra.gmra.mxu1 %vm430_vm1, %v1445_v33  ;;  %v671_v32 = vld [vmem:[#allocation7 + $0x198] sm:$0xff]  ;;  %s1280_s13 = scalar_lea.vmem %s1035_s12, 512  ;;  %p1285_p12 = scmp.lt.s32.totalorder %s1035_s12, %s1035_s12 }
 0x306   :  { %339 = vmax.xlane.f32.xlu1 %v338_v26  ;;  %729 = vmatpush1.msra.mxu1 %v680_v34  ;;  %v683_v26 = vld [vmem:[#allocation7 + $0x1f8] sm:$0xff]  ;;  %p1281_p11 = scmp.ne.s32.totalorder %s1035_s12, %s1280_s13  ;;  %p1286_p13 = scmp.lt.s32.totalorder %s1280_s13, %s1280_s13 }
 0x307   :  { %730 = vmatprep.subr.mxu1 %v677_v35  ;;  %1057 = vmatprep.mubr.msk.f32.mxu1 %vm430_vm1, %v1449_v48  ;;  %v667_v34 = vld [vmem:[#allocation7 + $0x178] sm:$0xff] }
 0x308   :  { %731 = vmatpush1.msra.mxu1 %v676_v36  ;;  %v663_v35 = vld [vmem:[#allocation7 + $0x158] sm:$0xff]  ;;  %p1287_p0 = por %p1286_p13, %p1285_p12 }
 0x309   :  { %732 = vmatprep.subr.mxu1 %v673_v37  ;;  %v659_v36 = vld [vmem:[#allocation7 + $0x138] sm:$0xff]  ;;  %v658_v37 = vld [vmem:[#allocation7 + $0x130] sm:$0xff] }
 0x30a   :  { %733 = vmatpush1.msra.mxu1 %v672_v38  ;;  %v655_v38 = vld [vmem:[#allocation7 + $0x118] sm:$0xff]  ;;  %p1288_p1 = pnand %p1287_p0, %p1281_p11 }
 0x30b   :  { %734 = vmatprep.subr.mxu1 %v669_v39  ;;  %v654_v39 = vld [vmem:[#allocation7 + $0x110] sm:$0xff] }
 0x30c   :  { %735 = vmatpush1.msra.mxu1 %v668_v40  ;;  %v651_v40 = vld [vmem:[#allocation7 + $0xf8] sm:$0xff] }
 0x30d   :  { %736 = vmatprep.subr.mxu1 %v665_v41  ;;  %v650_v41 = vld [vmem:[#allocation7 + $0xf0] sm:$0xff] }
 0x30e   :  { %737 = vmatpush1.msra.mxu1 %v664_v42  ;;  %v647_v42 = vld [vmem:[#allocation7 + $0xd8] sm:$0xff] }
 0x30f   :  { %738 = vmatprep.subr.mxu1 %v661_v43  ;;  %v646_v43 = vld [vmem:[#allocation7 + $0xd0] sm:$0xff] }
 0x310   :  { %739 = vmatpush1.msra.mxu1 %v660_v44  ;;  %v643_v44 = vld [vmem:[#allocation7 + $0xb8] sm:$0xff] }
 0x311   :  { %740 = vmatprep.subr.mxu1 %v657_v45  ;;  %v642_v45 = vld [vmem:[#allocation7 + $0xb0] sm:$0xff] }
 0x312   :  { %741 = vmatpush1.msra.mxu1 %v656_v46  ;;  %v639_v46 = vld [vmem:[#allocation7 + $0x98] sm:$0xff] }
 0x313   :  { %742 = vmatprep.subr.mxu1 %v653_v47  ;;  %v638_v47 = vld [vmem:[#allocation7 + $0x90] sm:$0xff] }
 0x314   :  { %743 = vmatpush1.msra.mxu1 %v652_v49  ;;  %v634_v49 = vld [vmem:[#allocation7 + $0x70] sm:$0xff] }
 0x315   :  { %744 = vmatprep.subr.mxu1 %v649_v50  ;;  %v631_v50 = vld [vmem:[#allocation7 + $0x58] sm:$0xff] }
 0x316   :  { %745 = vmatpush1.msra.mxu1 %v648_v51 }
 0x317   :  { %746 = vmatprep.subr.mxu1 %v645_v52  ;;  %v630_v52 = vld [vmem:[#allocation7 + $0x50] sm:$0xff] }
 0x318   :  { %747 = vmatpush1.msra.mxu1 %v644_v53  ;;  %v627_v53 = vld [vmem:[#allocation7 + $0x38] sm:$0xff] }
 0x319   :  { %748 = vmatprep.subr.mxu1 %v641_v54  ;;  %v626_v54 = vld [vmem:[#allocation7 + $0x30] sm:$0xff] }
 0x31a   :  { %749 = vmatpush1.msra.mxu1 %v640_v55  ;;  %v623_v55 = vld [vmem:[#allocation7 + $0x18] sm:$0xff] }
 0x31b   :  { %750 = vmatprep.subr.mxu1 %v637_v56 }
 0x31c   :  { %751 = vmatpush1.msra.mxu1 %v636_v57  ;;  %v622_v57 = vld [vmem:[#allocation7 + $0x10] sm:$0xff] }
 0x31d   :  { %752 = vmatprep.subr.mxu1 %v633_v58  ;;  %v691_v58 = vld [vmem:[#allocation7 + $0x238] sm:$0xff] }
 0x31e   :  { %753 = vmatpush1.msra.mxu1 %v632_v59  ;;  %v690_v59 = vld [vmem:[#allocation7 + $0x230] sm:$0xff] }
 0x31f   :  { %754 = vmatprep.subr.mxu1 %v629_v60  ;;  %v687_v60 = vld [vmem:[#allocation7 + $0x218] sm:$0xff] }
 0x320   :  { %755 = vmatpush1.msra.mxu1 %v628_v61 }
 0x321   :  { %756 = vmatprep.subr.mxu1 %v625_v62  ;;  %v686_v62 = vld [vmem:[#allocation7 + $0x210] sm:$0xff] }
 0x322   :  { %757 = vmatpush1.msra.mxu1 %v624_v63 }
 0x323   :  { %758 = vmatprep.subr.mxu1 %v621_v0 }
 0x324   :  { %759 = vmatpush1.msra.mxu1 %v620_v1 }
 0x325   :  { %788 = vmatprep.subr.mxu1 %v689_v2 }
 0x326   :  { %789 = vmatpush2.msra.mxu1 %v688_v3 }
 0x327   :  { %790 = vmatprep.subr.mxu1 %v685_v4 }
 0x328   :  { %791 = vmatpush2.msra.mxu1 %v684_v5 }
 0x329   :  { %793 = vmatmul.mubr.f32.vlgmr.msra.gmra.mxu1 %v1453_v6 }
 0x32a   :  { %1058 = vmatprep.mubr.msk.f32.mxu1 %vm430_vm1, %v1455_v7 }
 0x32d   :  { %799 = vmatmul.mubr.f32.gmra.mxu1 %v1460_v8 }
 0x32e   :  { %1059 = vmatprep.mubr.msk.f32.mxu1 %vm430_vm1, %v1466_v12 }
 0x331   :  { %805 = vmatmul.mubr.f32.gmra.mxu1 %v1470_v15 }
 0x332   :  { %1060 = vmatprep.mubr.msk.f32.mxu1 %vm430_vm1, %v1473_v16 }
 0x335   :  { %811 = vmatmul.mubr.f32.gmra.mxu1 %v1477_v17 }
 0x38f   :  { %v340_v27 = vpop.xlane.xlu1 %339 }
 0x390   :  { %v341_v28 = vsub.f32 %v337_v24, %v340_v27  ;;  %v682_v27 = vld [vmem:[#allocation7 + $0x1f0] sm:$0xff] }
 0x392   :  { %v342_v29 = vmul.f32 1.442695, %v341_v28  ;;  %v679_v28 = vld [vmem:[#allocation7 + $0x1d8] sm:$0xff] }
 0x394   :  { %1096 = vpow2.f32 %v342_v29  ;;  %v678_v29 = vld [vmem:[#allocation7 + $0x1d0] sm:$0xff] }
 0x3a1   :  { %v1438_v30 = vpop.eup %1096 }
 0x3a2   :  { %v344_v31 = vsel %vm181_vm0, %v1438_v30, 0.0 }
 0x3a3   :  { %345 = vadd.xlane.f32.xlu1 %v344_v31  ;;  %v674_v31 = vld [vmem:[#allocation7 + $0x1b0] sm:$0xff] }
 0x3b4   :  { %703 = vperm.xlu1 %1091, %v693_v18  }
 0x3b8   :  { %698 = vperm.xlu1 %1091, %v692_v21  }
 0x3bc   :  { %708 = vperm.xlu1 %1091, %v694_v22  }
 0x3c0   :  { %713 = vperm.xlu1 %1091, %v695_v23  }
 0x3c5   :  { %v500_v51 = vpop.f32.mrf.mxu1 }
 0x3c7   :  { %v502_v56 = vpop.f32.mrf.mxu1 }
 0x3e9   :  { %v794_v61 = vpop.f32.mrf.mxu1 }
 0x3eb   :  { %v796_v63 = vpop.f32.mrf.mxu1 }
 0x3ed   :  { %v800_v0 = vpop.f32.mrf.mxu1 }
 0x3ef   :  { %v802_v1 = vpop.f32.mrf.mxu1 }
 0x42c   :  { %v346_v9 = vpop.xlane.xlu1 %345 }
 0x42d   :  { %1098 = vrcp.f32 %v346_v9  ;;  %v581_v9 = vld [vmem:[#allocation10 + $0x8] sm:$0xff] }
 0x430   :  { %v1512_v3 = vpop.permute.xlu1 %703 }
 0x434   :  { %v1519_v21 = vpop.permute.xlu1 %698 }
 0x435   :  { %v795_v22 = vadd.f32 %v794_v61, %v1519_v21  ;;  %v797_v23 = vadd.f32 %v796_v63, %v1519_v21 }
 0x43a   :  { %v1099_v10 = vpop.eup %1098 }
 0x43b   :  { %v348_v11 = vmul.f32 %v1099_v10, %v1438_v30  ;;  %v675_v30 = vld [vmem:[#allocation7 + $0x1b8] sm:$0xff] }
 0x43d   :  { %1050 = vmatmul.mubr.msk.f32.vlgmr.msra.gmra.mxu0 %vm181_vm0, %v348_v11 }
 0x43e   :  { %569 = vmatprep.mubr.f32.mxu0 %v1339_v14  ;;  %v424_v14 = vld [vmem:[%s1554_s7] sm:$0xff] }
 0x43f   :  { %427 = vperm.xlu0 %1090, %v424_v14  }
 0x4ba   :  { %v1510_v2 = vpop.permute.xlu0 %427 }
 0x4bb   :  { %v501_v4 = vadd.f32 %v500_v51, %v1510_v2  ;;  %v503_v5 = vadd.f32 %v502_v56, %v1510_v2 }
 0x4bd   :  { %v576_v10 = vmax.f32 %v501_v4, 0.0  ;;  %v577_v11 = vmax.f32 %v503_v5, 0.0 }
 0x4bf   :  { %v585_v14 = vadd.f32 %v581_v9, %v577_v11 }
 0x4c1   :  { %v1054_v19 = vmul.f32 -1.442695, %v585_v14 }
 0x4fd   :  { %v418_v24 = vpop.f32.mrf.mxu0 }
 0x4ff   :  { %v420_v25 = vpop.f32.mrf.mxu0 }
 0x500   :  { %533 = vmatprep.subr.mxu0 %v420_v25 }
 0x501   :  { %534 = vmatpush1.msra.mxu0 %v418_v24  ;;  %v1065_v24 = vmul.f32 -1.442695, %v795_v22 }
 0x502   :  { %535 = vmatprep.subr.mxu0 %v1421_v13  ;;  %v670_v13 = vld [vmem:[#allocation7 + $0x190] sm:$0xff] }
 0x503   :  { %536 = vmatpush1.msra.mxu0 %v1432_v20  ;;  %v666_v20 = vld [vmem:[#allocation7 + $0x170] sm:$0xff] }
 0x504   :  { %1052 = vmatmul.mubr.msk.f32.vlgmr.msra.gmra.mxu0 %vm430_vm1, %v1445_v33  ;;  %817 = vmatprep.subr.mxu0 %v683_v26  ;;  %v662_v33 = vld [vmem:[#allocation7 + $0x150] sm:$0xff]  ;;  %v806_v26 = vpop.f32.mrf.mxu1 }
 0x505   :  { %818 = vmatpush1.msra.mxu0 %v682_v27  ;;  %1061 = vmatprep.mubr.msk.f32.mxu0 %vm430_vm1, %v1449_v48  ;;  %v635_v48 = vld [vmem:[#allocation7 + $0x78] sm:$0xff] }
 0x506   :  { %819 = vmatprep.subr.mxu0 %v679_v28 }
 0x507   :  { %820 = vmatpush1.msra.mxu0 %v678_v29 }
 0x508   :  { %821 = vmatprep.subr.mxu0 %v675_v30  ;;  %v1523_v30 = vpop.permute.xlu1 %708 }
 0x509   :  { %822 = vmatpush1.msra.mxu0 %v674_v31  ;;  %v808_v31 = vpop.f32.mrf.mxu1 }
 0x50a   :  { %823 = vmatprep.subr.mxu0 %v671_v32  ;;  %v807_v32 = vadd.f32 %v806_v26, %v1523_v30 }
 0x50b   :  { %824 = vmatpush1.msra.mxu0 %v670_v13 }
 0x50c   :  { %825 = vmatprep.subr.mxu0 %v667_v34  ;;  %v809_v34 = vadd.f32 %v808_v31, %v1523_v30 }
 0x50d   :  { %826 = vmatpush1.msra.mxu0 %v666_v20 }
 0x50e   :  { %827 = vmatprep.subr.mxu0 %v663_v35 }
 0x50f   :  { %828 = vmatpush1.msra.mxu0 %v662_v33 }
 0x510   :  { %829 = vmatprep.subr.mxu0 %v659_v36  ;;  %v1073_v36 = vmul.f32 -1.442695, %v807_v32 }
 0x511   :  { %830 = vmatpush1.msra.mxu0 %v658_v37  ;;  %v1074_v37 = vmul.f32 -1.442695, %v809_v34 }
 0x512   :  { %831 = vmatprep.subr.mxu0 %v655_v38 }
 0x513   :  { %832 = vmatpush1.msra.mxu0 %v654_v39  ;;  %v106_v39 = vld [vmem:[#allocation5] sm:$0xff] }
 0x514   :  { %833 = vmatprep.subr.mxu0 %v651_v40 }
 0x515   :  { %834 = vmatpush1.msra.mxu0 %v650_v41  ;;  %v107_v41 = vld [vmem:[#allocation5 + $0x8] sm:$0xff] }
 0x516   :  { %835 = vmatprep.subr.mxu0 %v647_v42 }
 0x517   :  { %836 = vmatpush1.msra.mxu0 %v646_v43 }
 0x518   :  { %837 = vmatprep.subr.mxu0 %v643_v44 }
 0x519   :  { %838 = vmatpush1.msra.mxu0 %v642_v45 }
 0x51a   :  { %839 = vmatprep.subr.mxu0 %v639_v46 }
 0x51b   :  { %840 = vmatpush1.msra.mxu0 %v638_v47 }
 0x51c   :  { %841 = vmatprep.subr.mxu0 %v635_v48  ;;  %v812_v48 = vpop.f32.mrf.mxu1 }
 0x51d   :  { %842 = vmatpush1.msra.mxu0 %v634_v49 }
 0x51e   :  { %843 = vmatprep.subr.mxu0 %v631_v50  ;;  %v1527_v50 = vpop.permute.xlu1 %713  ;;  %v814_v51 = vpop.f32.mrf.mxu1 }
 0x51f   :  { %844 = vmatpush1.msra.mxu0 %v630_v52 }
 0x520   :  { %845 = vmatprep.subr.mxu0 %v627_v53 }
 0x521   :  { %846 = vmatpush1.msra.mxu0 %v626_v54  ;;  %v813_v54 = vadd.f32 %v812_v48, %v1527_v50 }
 0x522   :  { %847 = vmatprep.subr.mxu0 %v623_v55  ;;  %v815_v55 = vadd.f32 %v814_v51, %v1527_v50 }
 0x523   :  { %848 = vmatpush1.msra.mxu0 %v622_v57 }
 0x524   :  { %877 = vmatprep.subr.mxu0 %v691_v58 }
 0x525   :  { %878 = vmatpush2.msra.mxu0 %v690_v59 }
 0x526   :  { %879 = vmatprep.subr.mxu0 %v687_v60 }
 0x527   :  { %880 = vmatpush2.msra.mxu0 %v686_v62 }
 0x528   :  { %882 = vmatmul.mubr.f32.vlgmr.msra.gmra.mxu0 %v1453_v6  ;;  %v801_v6 = vadd.f32 %v800_v0, %v1512_v3 }
 0x529   :  { %1062 = vmatprep.mubr.msk.f32.mxu0 %vm430_vm1, %v1455_v7  ;;  %v803_v7 = vadd.f32 %v802_v1, %v1512_v3 }
 0x52c   :  { %888 = vmatmul.mubr.f32.gmra.mxu0 %v1460_v8  ;;  %v580_v8 = vld [vmem:[#allocation10] sm:$0xff] }
 0x52d   :  { %1063 = vmatprep.mubr.msk.f32.mxu0 %vm430_vm1, %v1466_v12  ;;  %v1069_v12 = vmul.f32 -1.442695, %v801_v6 }
 0x52f   :  { %1100 = vpow2.f32 %v1069_v12 }
 0x530   :  { %894 = vmatmul.mubr.f32.gmra.mxu0 %v1470_v15  ;;  %v1070_v15 = vmul.f32 -1.442695, %v803_v7 }
 0x531   :  { %1064 = vmatprep.mubr.msk.f32.mxu0 %vm430_vm1, %v1473_v16  ;;  %v584_v16 = vadd.f32 %v580_v8, %v576_v10 }
 0x532   :  { %1102 = vpow2.f32 %v1070_v15 }
 0x533   :  { %v1053_v18 = vmul.f32 -1.442695, %v584_v16 }
 0x534   :  { %900 = vmatmul.mubr.f32.gmra.mxu0 %v1477_v17  ;;  %v1066_v17 = vmul.f32 -1.442695, %v797_v23 }
 0x535   :  { %1104 = vpow2.f32 %v1053_v18 }
 0x536   :  { %1106 = vpow2.f32 %v1054_v19 }
 0x537   :  { %1108 = vpow2.f32 %v1065_v24  ;;  %v582_v24 = vld [vmem:[#allocation10 + $0x10] sm:$0xff] }
 0x538   :  { %1110 = vpow2.f32 %v1066_v17 }
 0x53c   :  { %v1101_v25 = vpop.eup %1100 }
 0x53d   :  { %v942_v28 = vadd.f32 1.0, %v1101_v25  ;;  %v583_v25 = vld [vmem:[#allocation10 + $0x18] sm:$0xff] }
 0x53f   :  { %v1103_v27 = vpop.eup %1102  ;;  %1112 = vrcp.f32 %v942_v28 }
 0x540   :  { %v943_v29 = vadd.f32 1.0, %v1103_v27 }
 0x542   :  { %v1105_v13 = vpop.eup %1104  ;;  %1114 = vrcp.f32 %v943_v29 }
 0x543   :  { %v1107_v20 = vpop.eup %1106  ;;  %v600_v35 = vadd.f32 1.0, %v1105_v13 }
 0x544   :  { %v601_v33 = vadd.f32 1.0, %v1107_v20  ;;  %v1109_v38 = vpop.eup %1108 }
 0x545   :  { %1116 = vrcp.f32 %v600_v35  ;;  %v1111_v40 = vpop.eup %1110  ;;  %v918_v45 = vadd.f32 1.0, %v1109_v38 }
 0x546   :  { %1118 = vrcp.f32 %v601_v33  ;;  %v919_v47 = vadd.f32 1.0, %v1111_v40 }
 0x547   :  { %1120 = vpow2.f32 %v1073_v36 }
 0x548   :  { %1122 = vpow2.f32 %v1074_v37 }
 0x549   :  { %1124 = vrcp.f32 %v918_v45 }
 0x54a   :  { %1126 = vrcp.f32 %v919_v47 }
 0x54b   :  { %1128 = vtanh.f32 %v813_v54 }
 0x54c   :  { %v1113_v42 = vpop.eup %1112 }
 0x54d   :  { %v982_v44 = vmul.f32 %v1113_v42, %v106_v39 }
 0x54f   :  { %v1115_v43 = vpop.eup %1114 }
 0x550   :  { %v983_v46 = vmul.f32 %v1115_v43, %v107_v41 }
 0x552   :  { %v1117_v49 = vpop.eup %1116 }
 0x553   :  { %v1119_v52 = vpop.eup %1118  ;;  %v986_v53 = vadd.f32 %v1117_v49, %v982_v44 }
 0x554   :  { %v987_v56 = vadd.f32 %v1119_v52, %v983_v46  ;;  %v1121_v57 = vpop.eup %1120 }
 0x555   :  { %1014 = vst [vmem:[#allocation12] sm:$0xff] %v986_v53  ;;  %v1123_v58 = vpop.eup %1122  ;;  %v966_v59 = vadd.f32 1.0, %v1121_v57 }
 0x556   :  { %1130 = vtanh.f32 %v987_v56  ;;  %1015 = vst [vmem:[#allocation12 + $0x8] sm:$0xff] %v987_v56  ;;  %v967_v60 = vadd.f32 1.0, %v1123_v58  ;;  %v1125_v61 = vpop.eup %1124 }
 0x557   :  { %1132 = vtanh.f32 %v815_v55  ;;  %v1127_v62 = vpop.eup %1126 }
 0x558   :  { %1134 = vtanh.f32 %v986_v53  ;;  %v1129_v63 = vpop.eup %1128 }
 0x559   :  { %1136 = vrcp.f32 %v966_v59  ;;  %v998_v5 = vmul.f32 %v1129_v63, %v1125_v61 }
 0x55a   :  { %1138 = vrcp.f32 %v967_v60  ;;  %v108_v60 = vld [vmem:[#allocation5 + $0x10] sm:$0xff] }
 0x563   :  { %v1131_v0 = vpop.eup %1130 }
 0x564   :  { %v1133_v1 = vpop.eup %1132 }
 0x565   :  { %v1135_v4 = vpop.eup %1134  ;;  %v999_v7 = vmul.f32 %v1133_v1, %v1127_v62 }
 0x566   :  { %v1137_v6 = vpop.eup %1136 }
 0x567   :  { %v1139_v8 = vpop.eup %1138  ;;  %v994_v9 = vmul.f32 %v1137_v6, %v1135_v4 }
 0x568   :  { %v995_v10 = vmul.f32 %v1139_v8, %v1131_v0  ;;  %v109_v0 = vld [vmem:[#allocation5 + $0x18] sm:$0xff] }
 0x569   :  { %v1002_v11 = vadd.f32 %v998_v5, %v994_v9 }
 0x56a   :  { %v1003_v12 = vadd.f32 %v999_v7, %v995_v10 }
 0x56b   :  { %v1006_v15 = vadd.f32 %v1117_v49, %v1002_v11 }
 0x56c   :  { %v1007_v16 = vadd.f32 %v1119_v52, %v1003_v12 }
 0x56d   :  { %1010 = vst [vmem:[#allocation11] sm:$0xff] %v1006_v15 }
 0x56e   :  { %1011 = vst [vmem:[#allocation11 + $0x8] sm:$0xff] %v1007_v16 }
 0x5c4   :  { %v571_v14 = vpop.f32.mrf.mxu0 }
 0x5c5   :  { %v572_v19 = vadd.f32 %v571_v14, %v1510_v2 }
 0x5c6   :  { %v573_v18 = vpop.f32.mrf.mxu0 }
 0x5c7   :  { %v574_v22 = vadd.f32 %v573_v18, %v1510_v2  ;;  %v578_v23 = vmax.f32 %v572_v19, 0.0 }
 0x5c9   :  { %v579_v17 = vmax.f32 %v574_v22, 0.0  ;;  %v586_v26 = vadd.f32 %v582_v24, %v578_v23 }
 0x5cb   :  { %v587_v27 = vadd.f32 %v583_v25, %v579_v17  ;;  %v1055_v29 = vmul.f32 -1.442695, %v586_v26 }
 0x5cd   :  { %v1056_v32 = vmul.f32 -1.442695, %v587_v27  ;;  %1140 = vpow2.f32 %v1055_v29 }
 0x5cf   :  { %1142 = vpow2.f32 %v1056_v32 }
 0x5da   :  { %v1141_v45 = vpop.eup %1140 }
 0x5db   :  { %v602_v48 = vadd.f32 1.0, %v1141_v45 }
 0x5dc   :  { %v1143_v46 = vpop.eup %1142 }
 0x5e8   :  { %v883_v28 = vpop.f32.mrf.mxu0 }
 0x5e9   :  { %v884_v37 = vadd.f32 %v883_v28, %v1519_v21 }
 0x5ea   :  { %v885_v31 = vpop.f32.mrf.mxu0 }
 0x5eb   :  { %v886_v38 = vadd.f32 %v885_v31, %v1519_v21  ;;  %v1067_v41 = vmul.f32 -1.442695, %v884_v37  ;;  %v603_v21 = vadd.f32 1.0, %v1143_v46 }
 0x5ec   :  { %v889_v13 = vpop.f32.mrf.mxu0 }
 0x5ed   :  { %v890_v34 = vadd.f32 %v889_v13, %v1512_v3  ;;  %v1068_v43 = vmul.f32 -1.442695, %v886_v38 }
 0x5ee   :  { %v891_v20 = vpop.f32.mrf.mxu0 }
 0x5ef   :  { %v1071_v35 = vmul.f32 -1.442695, %v890_v34  ;;  %v892_v33 = vadd.f32 %v891_v20, %v1512_v3 }
 0x5f0   :  { %v895_v36 = vpop.f32.mrf.mxu0 }
 0x5f1   :  { %1144 = vpow2.f32 %v1071_v35  ;;  %v1072_v2 = vmul.f32 -1.442695, %v892_v33  ;;  %v896_v40 = vadd.f32 %v895_v36, %v1523_v30 }
 0x5f2   :  { %v897_v39 = vpop.f32.mrf.mxu0 }
 0x5f3   :  { %1146 = vpow2.f32 %v1072_v2  ;;  %v898_v42 = vadd.f32 %v897_v39, %v1523_v30  ;;  %v1075_v44 = vmul.f32 -1.442695, %v896_v40 }
 0x5f4   :  { %1148 = vpow2.f32 %v1067_v41  ;;  %v901_v53 = vpop.f32.mrf.mxu0 }
 0x5f5   :  { %v1076_v3 = vmul.f32 -1.442695, %v898_v42  ;;  %1150 = vpow2.f32 %v1068_v43  ;;  %v902_v56 = vadd.f32 %v901_v53, %v1527_v50 }
 0x5f6   :  { %1152 = vpow2.f32 %v1075_v44  ;;  %v903_v30 = vpop.f32.mrf.mxu0 }
 0x5f7   :  { %1154 = vpow2.f32 %v1076_v3  ;;  %v904_v58 = vadd.f32 %v903_v30, %v1527_v50 }
 0x5fe   :  { %v1145_v47 = vpop.eup %1144 }
 0x5ff   :  { %v944_v49 = vadd.f32 1.0, %v1145_v47 }
 0x600   :  { %v1147_v51 = vpop.eup %1146 }
 0x601   :  { %1156 = vrcp.f32 %v944_v49  ;;  %v945_v52 = vadd.f32 1.0, %v1147_v51  ;;  %v1149_v54 = vpop.eup %1148 }
 0x602   :  { %1158 = vrcp.f32 %v602_v48  ;;  %v1151_v55 = vpop.eup %1150  ;;  %v920_v59 = vadd.f32 1.0, %v1149_v54 }
 0x603   :  { %1160 = vrcp.f32 %v945_v52  ;;  %v1153_v57 = vpop.eup %1152  ;;  %v921_v62 = vadd.f32 1.0, %v1151_v55 }
 0x604   :  { %1162 = vrcp.f32 %v603_v21  ;;  %v1155_v61 = vpop.eup %1154  ;;  %v968_v1 = vadd.f32 1.0, %v1153_v57 }
 0x605   :  { %1164 = vtanh.f32 %v902_v56  ;;  %v969_v7 = vadd.f32 1.0, %v1155_v61 }
 0x606   :  { %1166 = vtanh.f32 %v904_v58 }
 0x607   :  { %1168 = vrcp.f32 %v920_v59 }
 0x608   :  { %1170 = vrcp.f32 %v921_v62 }
 0x609   :  { %1172 = vrcp.f32 %v968_v1 }
 0x60e   :  { %v1157_v63 = vpop.eup %1156 }
 0x60f   :  { %v1159_v4 = vpop.eup %1158  ;;  %v984_v5 = vmul.f32 %v1157_v63, %v108_v60 }
 0x610   :  { %v1161_v6 = vpop.eup %1160 }
 0x611   :  { %v988_v8 = vadd.f32 %v1159_v4, %v984_v5  ;;  %v985_v9 = vmul.f32 %v1161_v6, %v109_v0  ;;  %v1163_v50 = vpop.eup %1162 }
 0x613   :  { %1174 = vtanh.f32 %v988_v8  ;;  %1016 = vst [vmem:[#allocation12 + $0x10] sm:$0xff] %v988_v8  ;;  %v989_v10 = vadd.f32 %v1163_v50, %v985_v9 }
 0x614   :  { %1176 = vrcp.f32 %v969_v7 }
 0x615   :  { %1178 = vtanh.f32 %v989_v10  ;;  %1017 = vst [vmem:[#allocation12 + $0x18] sm:$0xff] %v989_v10 }
 0x616   :  { %1291 = shalt.err (!%p1288_p1)
}
 0x617   :  { %1037 = dma.vmem_to_hbm [thread:$0]  %s1035_s12, 512, %s1557_s10, [#allocation13]   ;;  %v1165_v11 = vpop.eup %1164 }
 0x618   :  { %v1167_v12 = vpop.eup %1166  ;;  %s1342_s16 = smov [#allocation11]  }
 0x619   :  { %v1169_v15 = vpop.eup %1168  ;;  %s1024_s17 = sshll.u32 %s1342_s16, 4  ;;  %s1025_s17 = int_to_ptr.vmem [resolvable:$true] %s1024_s17 }
 0x61a   :  { %v1171_v16 = vpop.eup %1170  ;;  %v1000_v23 = vmul.f32 %v1169_v15, %v1165_v11  ;;  %s1300_s10 = scalar_lea.vmem %s1025_s17, 512  ;;  %p1305_p3 = scmp.lt.s32.totalorder %s1025_s17, %s1025_s17 }
 0x61b   :  { %v1173_v14 = vpop.eup %1172  ;;  %v1001_v25 = vmul.f32 %v1171_v16, %v1167_v12  ;;  %p1301_p2 = scmp.ne.s32.totalorder %s1025_s17, %s1300_s10  ;;  %p1306_p4 = scmp.lt.s32.totalorder %s1300_s10, %s1300_s10 }
 0x61d   :  { %p1307_p5 = por %p1306_p4, %p1305_p3 }
 0x61f   :  { %p1308_p6 = pnand %p1307_p5, %p1301_p2 }
 0x620   :  { %v1175_v18 = vpop.eup %1174 }
 0x621   :  { %v1177_v19 = vpop.eup %1176  ;;  %v996_v22 = vmul.f32 %v1175_v18, %v1173_v14 }
 0x622   :  { %v1179_v24 = vpop.eup %1178 }
 0x623   :  { %v997_v17 = vmul.f32 %v1179_v24, %v1177_v19  ;;  %v1004_v26 = vadd.f32 %v1000_v23, %v996_v22 }
 0x625   :  { %v1005_v27 = vadd.f32 %v1001_v25, %v997_v17  ;;  %v1008_v28 = vadd.f32 %v1159_v4, %v1004_v26 }
 0x627   :  { %v1009_v29 = vadd.f32 %v1163_v50, %v1005_v27  ;;  %1012 = vst [vmem:[#allocation11 + $0x10] sm:$0xff] %v1008_v28 }
 0x629   :  { %1013 = vst [vmem:[#allocation11 + $0x18] sm:$0xff] %v1009_v29 }
 0x62a   :  { %1311 = shalt.err (!%p1308_p6)
}
 0x62b   :  { %1027 = dma.vmem_to_hbm [thread:$0]  %s1025_s17, 512, %s1556_s9, [#allocation4]  }
 0x62c   :  { %1326 = dma.done.wait [#allocation4], 512  }
 0x62d   :  { %1327 = vsyncadd [#allocation4], 4294966784 }
 0x62e   :  { %1328 = dma.done.wait [#allocation13], 512  }
 0x62f   :  { %1329 = vsyncadd [#allocation13], 4294966784 }
 0x630   :  { %1044 = vsyncpa [#allocation3], 1 }
 0x631   :  { %1045 = vsyncpa [#allocation6], 1 }
 0x632   :  { %1046 = vsyncpa [#allocation9], 1 }
 0x633   :  { %1047 = vsyncpa [#allocation4], 1 }
 0x634   :  { %1048 = vsyncpa [#allocation13], 1 }

</bundles_post_ra>
